<compile_context>
chip_gen: v7x
topology: tpu7x:2x2x1
jax: 0.10.0
libtpu: 0.0.40
codegen_flags: <defaults>
</compile_context>

<pallas_src>
import functools

import jax
import jax.numpy as jnp
from jax.experimental import pallas as pl
from jax.experimental.pallas import tpu as pltpu


def _round_up(n, m):
    return -(-n // m) * m


# ---------------------------------------------------------------------------
# Pallas kernel: whole encode/decode MLP hot path (5 matmuls + ReLU/sigmoid)
# ---------------------------------------------------------------------------
def ae_mid_kernel(x_ref,
                  w1_ref, b1_ref, w2_ref, b2_ref, w34_ref, b34_ref,
                  w5_ref, b5_ref, w6_ref, b6_ref,
                  out_ref):
    def linear(h, w_ref, b_ref):
        # bf16 MXU operands, f32 accumulate; bias add stays in f32 (VPU).
        return jnp.dot(h.astype(jnp.bfloat16), w_ref[...],
                       preferred_element_type=jnp.float32) + b_ref[...]

    x = x_ref[...]                                            # (tile_rows, D)

    h = jnp.maximum(linear(x, w1_ref, b1_ref), 0.0)           # fc1 + relu
    h = jnp.maximum(linear(h, w2_ref, b2_ref), 0.0)           # fc2 + relu
    # fused fc3+fc4 (no nonlinearity between them in the original model),
    # followed by the decode-side ReLU that the PyTorch code applies to fc4.
    h = jnp.maximum(linear(h, w34_ref, b34_ref), 0.0)         # fc3∘fc4 + relu
    h = jnp.maximum(linear(h, w5_ref, b5_ref), 0.0)           # fc5 + relu
    h = linear(h, w6_ref, b6_ref)                             # fc6

    # sigmoid in f32, cast to the caller's dtype; direct store at the true
    # output width (avoids a padded buffer + wrapper-slice HBM round trip).
    out_ref[...] = jax.nn.sigmoid(h).astype(out_ref.dtype)


# ---------------------------------------------------------------------------
# Parameters
# ---------------------------------------------------------------------------
def make_ae_mid_params(key, input_size, bottleneck_size=5, dtype=jnp.float32):
    """PyTorch-default-style init (uniform +-1/sqrt(fan_in)).

    Returns the *logical* parameters as a list of (W, b) with W stored
    (in_features, out_features) so each layer is y = x @ W + b.
    """
    l1 = int(float(input_size) / 1.5)
    l2 = int(float(input_size) / 3)
    l3 = bottleneck_size
    dims = [(input_size, l1), (l1, l2), (l2, l3),
            (l3, l2), (l2, l1), (l1, input_size)]
    params = []
    for fan_in, fan_out in dims:
        key, kw, kb = jax.random.split(key, 3)
        bound = 1.0 / (float(fan_in) ** 0.5)
        w = jax.random.uniform(kw, (fan_in, fan_out), dtype,
                               minval=-bound, maxval=bound)
        b = jax.random.uniform(kb, (fan_out,), dtype,
                               minval=-bound, maxval=bound)
        params.append((w, b))
    return params


def pack_ae_mid_params(params, *, lane=128, weight_dtype=jnp.bfloat16):
    """Fold fc3+fc4 into one linear, pad hidden widths to multiples of 128,
    cast weights to bf16 (all done once, outside the jit hot path).

    * Fold is exact linear algebra (done in f32 before the bf16 cast):
        fc4(fc3(h)) = h @ (W3 @ W4) + (b3 @ W4 + b4)
    * Zero padding is exact: padded columns stay exactly 0 through bias(0)
      and ReLU and contribute 0 to the next matmul.
    * The LAST layer's output width is kept at the true input_size so the
      kernel can store lane-masked but without a padded-buffer + slice
      writeback.  Biases stay f32 (elementwise path is f32, incl. v5e).
    """
    (w1, b1), (w2, b2), (w3, b3), (w4, b4), (w5, b5), (w6, b6) = params

    w34 = jnp.dot(w3.astype(jnp.float32), w4.astype(jnp.float32))
    b34 = jnp.dot(b3.astype(jnp.float32), w4.astype(jnp.float32)) \
        + b4.astype(jnp.float32)

    layers = [(w1, b1), (w2, b2), (w34, b34), (w5, b5), (w6, b6)]
    packed = []
    in_pad = w1.shape[0]                    # first layer keeps true input dim
    for idx, (w, b) in enumerate(layers):
        fan_in, fan_out = w.shape
        last = idx == len(layers) - 1
        out_pad = fan_out if last else _round_up(fan_out, lane)
        wp = jnp.zeros((in_pad, out_pad), weight_dtype)
        wp = wp.at[:fan_in, :fan_out].set(w.astype(weight_dtype))
        bp = jnp.zeros((1, out_pad), jnp.float32)
        bp = bp.at[:, :fan_out].set(b.astype(jnp.float32))
        packed += [wp, bp]
        in_pad = out_pad
    return packed


# ---------------------------------------------------------------------------
# Wrapper: pallas_call with row-tiled grid, all weights resident in VMEM
# ---------------------------------------------------------------------------
def _auto_row_tile(rows):
    """Pick a row tile.

    * Small batches (<= 1024 rows): a single grid step — per-step overhead
      (~0.35us) dominates the sub-microsecond matmul chain, so splitting
      across v7x's two TensorCores costs more than it buys.
    * Large batches: biggest 512/1024 tile that divides `rows` (no jnp.pad
      pass, no output row slice), preferring an even step count so both v7x
      TensorCores get equal work under dimension_semantics=('parallel',).
      512-1024 tiles reach ~85% of HBM roofline vs ~63% at 256.
    """
    if rows <= 1024:
        return rows if rows % 8 == 0 else _round_up(rows, 8)
    candidates = (1024, 512, 256, 128, 64, 32, 16, 8)
    for t in candidates:                        # exact divisor + even steps
        if rows % t == 0 and (rows // t) % 2 == 0:
            return t
    for t in candidates:                        # any exact divisor
        if rows % t == 0:
            return t
    return 1024                                 # ragged tail: fall back to pad


def _vmem_budget_bytes(row_tile, input_size, out_width, packed_params, dtype):
    """Estimate required VMEM: double-buffered x/out tiles + resident weights
    (Pallas allocates 2 buffers per input by default).  Used to size
    vmem_limit_bytes with headroom, portable to v7x's 64 MiB VMEM."""
    itemsize = jnp.dtype(dtype).itemsize
    x_bytes = 2 * row_tile * input_size * itemsize
    o_bytes = 2 * row_tile * out_width * itemsize
    w_bytes = 2 * sum(int(p.size) * jnp.dtype(p.dtype).itemsize
                      for p in packed_params)
    return x_bytes + o_bytes + w_bytes


@functools.partial(jax.jit, static_argnames=("input_size", "row_tile"))
def ae_mid_forward(x, packed_params, *, input_size, row_tile=None):
    """Equivalent of AEModel(input_size, model_type='mid').forward(x)."""
    orig_dtype = x.dtype
    x2d = x.reshape(-1, input_size)            # x.view(-1, D), native dtype
    rows = x2d.shape[0]

    if row_tile is None:
        row_tile = _auto_row_tile(rows)
    rows_pad = _round_up(rows, row_tile)
    if rows_pad != rows:                       # static decision; rare with the
        x2d = jnp.pad(x2d, ((0, rows_pad - rows), (0, 0)))  # divisor heuristic

    out_width = packed_params[-1].shape[-1]    # == input_size (last layer
                                               #    output is NOT lane-padded)

    # Weights/biases: full-array blocks, constant index -> DMA'd once and kept
    # resident in VMEM across all grid steps.
    # NOTE: if input_size scales to 1-4K, consider pipeline_mode=pl.Buffered(1)
    # on these constant-index specs to halve their resident-VMEM footprint.
    full = lambda arr: pl.BlockSpec(arr.shape, lambda i: (0,) * arr.ndim)
    in_specs = [pl.BlockSpec((row_tile, input_size), lambda i: (i, 0))]
    in_specs += [full(p) for p in packed_params]

    need = _vmem_budget_bytes(row_tile, input_size, out_width,
                              packed_params, orig_dtype)
    vmem_limit = int(min(64 * 1024 * 1024,          # v7x physical ceiling
                         max(2 * need, 16 * 1024 * 1024)))

    out = pl.pallas_call(
        ae_mid_kernel,
        out_shape=jax.ShapeDtypeStruct((rows_pad, out_width), orig_dtype),
        grid=(rows_pad // row_tile,),
        in_specs=in_specs,
        out_specs=pl.BlockSpec((row_tile, out_width), lambda i: (i, 0)),
        compiler_params=pltpu.CompilerParams(
            dimension_semantics=("parallel",),      # megacore-shard the rows
            vmem_limit_bytes=vmem_limit,
        ),
    )(x2d, *packed_params)

    if rows_pad != rows:                       # only when row padding happened
        out = out[:rows]
    return out


# ---------------------------------------------------------------------------
# Pure-JAX references (for in-script sanity checks)
# ---------------------------------------------------------------------------
def ae_mid_reference_f32(x, params, input_size):
    """Full-precision, unfused 6-layer forward (PyTorch-equivalent math)."""
    def lin(h, w, b):
        return jnp.dot(h, w.astype(jnp.float32),
                       preferred_element_type=jnp.float32) + b.astype(jnp.float32)

    (w1, b1), (w2, b2), (w3, b3), (w4, b4), (w5, b5), (w6, b6) = params
    h = x.reshape(-1, input_size).astype(jnp.float32)
    h = jnp.maximum(lin(h, w1, b1), 0.0)
    h = jnp.maximum(lin(h, w2, b2), 0.0)
    h = lin(h, w3, b3)
    h = jnp.maximum(lin(h, w4, b4), 0.0)
    h = jnp.maximum(lin(h, w5, b5), 0.0)
    h = lin(h, w6, b6)
    return jax.nn.sigmoid(h)


def ae_mid_reference_packed(x, packed_params, input_size):
    """Mirrors the kernel math exactly (fused/padded bf16 weights, bf16
    operands, f32 accumulate, ReLU after every layer but the last)."""
    h = x.reshape(-1, input_size).astype(jnp.float32)
    n = len(packed_params)
    for i in range(0, n, 2):
        w, b = packed_params[i], packed_params[i + 1]
        h = jnp.dot(h.astype(jnp.bfloat16), w,
                    preferred_element_type=jnp.float32) + b
        if i < n - 2:
            h = jnp.maximum(h, 0.0)
    return jax.nn.sigmoid(h)


if __name__ == "__main__":
    INPUT_SIZE = 64          # feature dim the autoencoder reconstructs
    BOTTLENECK = 5

    key = jax.random.PRNGKey(0)
    kx, kp = jax.random.split(key)

    # NCHW-shaped input like the PyTorch usage; forward flattens it to
    # (-1, input_size): 2*4*16*16 = 2048 elems -> 32 rows of 64 features.
    x = jax.random.uniform(kx, (2, 4, 16, 16), jnp.float32)

    raw_params = make_ae_mid_params(kp, INPUT_SIZE, BOTTLENECK)
    packed_params = pack_ae_mid_params(raw_params)

    out = ae_mid_forward(x, packed_params, input_size=INPUT_SIZE)
    out = jax.block_until_ready(out)
    assert out.shape == (32, INPUT_SIZE)

    # Tight check vs a reference using exactly the kernel's fused/bf16 math.
    ref_kernel_math = ae_mid_reference_packed(x, packed_params, INPUT_SIZE)
    assert jnp.allclose(out, ref_kernel_math, atol=1e-3, rtol=1e-3), \
        "mismatch vs fused-bf16 reference"

    # Loose check vs the full-f32 PyTorch-equivalent math (bf16 operand error
    # only; the fc3/fc4 fold itself is exact and done in f32).
    ref_f32 = ae_mid_reference_f32(x, raw_params, INPUT_SIZE)
    assert jnp.allclose(out, ref_f32, atol=5e-2), "mismatch vs f32 reference"

    print("KERNEL_OK")
</pallas_src>

<mosaic_0001>
module attributes {stable_mosaic.version = 11 : i64} {
  func.func @ae_mid_kernel(%arg0: i32, %arg1: memref<32x64xf32, #tpu.memory_space<vmem>>, %arg2: memref<64x128xbf16, #tpu.memory_space<vmem>>, %arg3: memref<1x128xf32, #tpu.memory_space<vmem>>, %arg4: memref<128x128xbf16, #tpu.memory_space<vmem>>, %arg5: memref<1x128xf32, #tpu.memory_space<vmem>>, %arg6: memref<128x128xbf16, #tpu.memory_space<vmem>>, %arg7: memref<1x128xf32, #tpu.memory_space<vmem>>, %arg8: memref<128x128xbf16, #tpu.memory_space<vmem>>, %arg9: memref<1x128xf32, #tpu.memory_space<vmem>>, %arg10: memref<128x64xbf16, #tpu.memory_space<vmem>>, %arg11: memref<1x64xf32, #tpu.memory_space<vmem>>, %arg12: memref<32x64xf32, #tpu.memory_space<vmem>>) attributes {dimension_semantics = [#tpu.dimension_semantics<parallel>], iteration_bounds = array<i64: 1>, scalar_prefetch = 0 : i64, scratch_operands = 0 : i64, tpu.core_type = #tpu.core_type<tc>, window_params = [{transform_indices = @transform_0, window_bounds = array<i64: 32, 64>}, {pipeline_mode = #tpu.pipeline_mode<synchronous>, transform_indices = @transform_1, window_bounds = array<i64: 64, 128>}, {pipeline_mode = #tpu.pipeline_mode<synchronous>, transform_indices = @transform_2, window_bounds = array<i64: 1, 128>}, {pipeline_mode = #tpu.pipeline_mode<synchronous>, transform_indices = @transform_3, window_bounds = array<i64: 128, 128>}, {pipeline_mode = #tpu.pipeline_mode<synchronous>, transform_indices = @transform_4, window_bounds = array<i64: 1, 128>}, {pipeline_mode = #tpu.pipeline_mode<synchronous>, transform_indices = @transform_5, window_bounds = array<i64: 128, 128>}, {pipeline_mode = #tpu.pipeline_mode<synchronous>, transform_indices = @transform_6, window_bounds = array<i64: 1, 128>}, {pipeline_mode = #tpu.pipeline_mode<synchronous>, transform_indices = @transform_7, window_bounds = array<i64: 128, 128>}, {pipeline_mode = #tpu.pipeline_mode<synchronous>, transform_indices = @transform_8, window_bounds = array<i64: 1, 128>}, {pipeline_mode = #tpu.pipeline_mode<synchronous>, transform_indices = @transform_9, window_bounds = array<i64: 128, 64>}, {pipeline_mode = #tpu.pipeline_mode<synchronous>, transform_indices = @transform_10, window_bounds = array<i64: 1, 64>}, {transform_indices = @transform_11, window_bounds = array<i64: 32, 64>}]} {
    %c0 = arith.constant 0 : index
    %c0_0 = arith.constant 0 : index
    %0 = vector.load %arg1[%c0, %c0_0] : memref<32x64xf32, #tpu.memory_space<vmem>>, vector<32x64xf32>
    %1 = arith.truncf %0 : vector<32x64xf32> to vector<32x64xbf16>
    %c0_1 = arith.constant 0 : index
    %c0_2 = arith.constant 0 : index
    %2 = vector.load %arg2[%c0_1, %c0_2] : memref<64x128xbf16, #tpu.memory_space<vmem>>, vector<64x128xbf16>
    %cst = arith.constant dense<0.000000e+00> : vector<32x128xf32>
    %3 = tpu.matmul %1, %2, %cst {dimension_numbers = #tpu.dot_dimension_numbers<[1], [0], [0], [1], [0, 0, 1, 1], [], []>} : vector<32x64xbf16>, vector<64x128xbf16>, vector<32x128xf32> -> vector<32x128xf32>
    %c0_3 = arith.constant 0 : index
    %c0_4 = arith.constant 0 : index
    %4 = vector.load %arg3[%c0_3, %c0_4] : memref<1x128xf32, #tpu.memory_space<vmem>>, vector<1x128xf32>
    %5 = vector.broadcast %4 : vector<1x128xf32> to vector<32x128xf32>
    %6 = arith.addf %3, %5 : vector<32x128xf32>
    %cst_5 = arith.constant 0.000000e+00 : f32
    %7 = vector.broadcast %cst_5 : f32 to vector<32x128xf32>
    %8 = arith.maximumf %6, %7 : vector<32x128xf32>
    %9 = arith.truncf %8 : vector<32x128xf32> to vector<32x128xbf16>
    %c0_6 = arith.constant 0 : index
    %c0_7 = arith.constant 0 : index
    %10 = vector.load %arg4[%c0_6, %c0_7] : memref<128x128xbf16, #tpu.memory_space<vmem>>, vector<128x128xbf16>
    %cst_8 = arith.constant dense<0.000000e+00> : vector<32x128xf32>
    %11 = tpu.matmul %9, %10, %cst_8 {dimension_numbers = #tpu.dot_dimension_numbers<[1], [0], [0], [1], [0, 0, 1, 1], [], []>} : vector<32x128xbf16>, vector<128x128xbf16>, vector<32x128xf32> -> vector<32x128xf32>
    %c0_9 = arith.constant 0 : index
    %c0_10 = arith.constant 0 : index
    %12 = vector.load %arg5[%c0_9, %c0_10] : memref<1x128xf32, #tpu.memory_space<vmem>>, vector<1x128xf32>
    %13 = vector.broadcast %12 : vector<1x128xf32> to vector<32x128xf32>
    %14 = arith.addf %11, %13 : vector<32x128xf32>
    %cst_11 = arith.constant 0.000000e+00 : f32
    %15 = vector.broadcast %cst_11 : f32 to vector<32x128xf32>
    %16 = arith.maximumf %14, %15 : vector<32x128xf32>
    %17 = arith.truncf %16 : vector<32x128xf32> to vector<32x128xbf16>
    %c0_12 = arith.constant 0 : index
    %c0_13 = arith.constant 0 : index
    %18 = vector.load %arg6[%c0_12, %c0_13] : memref<128x128xbf16, #tpu.memory_space<vmem>>, vector<128x128xbf16>
    %cst_14 = arith.constant dense<0.000000e+00> : vector<32x128xf32>
    %19 = tpu.matmul %17, %18, %cst_14 {dimension_numbers = #tpu.dot_dimension_numbers<[1], [0], [0], [1], [0, 0, 1, 1], [], []>} : vector<32x128xbf16>, vector<128x128xbf16>, vector<32x128xf32> -> vector<32x128xf32>
    %c0_15 = arith.constant 0 : index
    %c0_16 = arith.constant 0 : index
    %20 = vector.load %arg7[%c0_15, %c0_16] : memref<1x128xf32, #tpu.memory_space<vmem>>, vector<1x128xf32>
    %21 = vector.broadcast %20 : vector<1x128xf32> to vector<32x128xf32>
    %22 = arith.addf %19, %21 : vector<32x128xf32>
    %cst_17 = arith.constant 0.000000e+00 : f32
    %23 = vector.broadcast %cst_17 : f32 to vector<32x128xf32>
    %24 = arith.maximumf %22, %23 : vector<32x128xf32>
    %25 = arith.truncf %24 : vector<32x128xf32> to vector<32x128xbf16>
    %c0_18 = arith.constant 0 : index
    %c0_19 = arith.constant 0 : index
    %26 = vector.load %arg8[%c0_18, %c0_19] : memref<128x128xbf16, #tpu.memory_space<vmem>>, vector<128x128xbf16>
    %cst_20 = arith.constant dense<0.000000e+00> : vector<32x128xf32>
    %27 = tpu.matmul %25, %26, %cst_20 {dimension_numbers = #tpu.dot_dimension_numbers<[1], [0], [0], [1], [0, 0, 1, 1], [], []>} : vector<32x128xbf16>, vector<128x128xbf16>, vector<32x128xf32> -> vector<32x128xf32>
    %c0_21 = arith.constant 0 : index
    %c0_22 = arith.constant 0 : index
    %28 = vector.load %arg9[%c0_21, %c0_22] : memref<1x128xf32, #tpu.memory_space<vmem>>, vector<1x128xf32>
    %29 = vector.broadcast %28 : vector<1x128xf32> to vector<32x128xf32>
    %30 = arith.addf %27, %29 : vector<32x128xf32>
    %cst_23 = arith.constant 0.000000e+00 : f32
    %31 = vector.broadcast %cst_23 : f32 to vector<32x128xf32>
    %32 = arith.maximumf %30, %31 : vector<32x128xf32>
    %33 = arith.truncf %32 : vector<32x128xf32> to vector<32x128xbf16>
    %c0_24 = arith.constant 0 : index
    %c0_25 = arith.constant 0 : index
    %34 = vector.load %arg10[%c0_24, %c0_25] : memref<128x64xbf16, #tpu.memory_space<vmem>>, vector<128x64xbf16>
    %cst_26 = arith.constant dense<0.000000e+00> : vector<32x64xf32>
    %35 = tpu.matmul %33, %34, %cst_26 {dimension_numbers = #tpu.dot_dimension_numbers<[1], [0], [0], [1], [0, 0, 1, 1], [], []>} : vector<32x128xbf16>, vector<128x64xbf16>, vector<32x64xf32> -> vector<32x64xf32>
    %c0_27 = arith.constant 0 : index
    %c0_28 = arith.constant 0 : index
    %36 = vector.load %arg11[%c0_27, %c0_28] : memref<1x64xf32, #tpu.memory_space<vmem>>, vector<1x64xf32>
    %37 = vector.broadcast %36 : vector<1x64xf32> to vector<32x64xf32>
    %38 = arith.addf %35, %37 : vector<32x64xf32>
    %39 = arith.negf %38 : vector<32x64xf32>
    %40 = math.exp %39 : vector<32x64xf32>
    %cst_29 = arith.constant 1.000000e+00 : f32
    %41 = vector.broadcast %cst_29 : f32 to vector<32x64xf32>
    %42 = arith.addf %41, %40 : vector<32x64xf32>
    %43 = arith.divf %41, %42 : vector<32x64xf32>
    %c0_30 = arith.constant 0 : index
    %c0_31 = arith.constant 0 : index
    %44 = vector.load %arg12[%c0_30, %c0_31] : memref<32x64xf32, #tpu.memory_space<vmem>>, vector<32x64xf32>
    tpu.vector_store %arg12[%c0_30, %c0_31], %43 {strides = array<i32>} : memref<32x64xf32, #tpu.memory_space<vmem>>, vector<32x64xf32>,
    return
  }
  func.func @transform_0(%arg0: i32) -> (i32, i32) {
    %c0_i32 = arith.constant 0 : i32
    %c0_i32_0 = arith.constant 0 : i32
    return %arg0, %c0_i32 : i32, i32
  }
  func.func @transform_1(%arg0: i32) -> (i32, i32) {
    %c0_i32 = arith.constant 0 : i32
    %c0_i32_0 = arith.constant 0 : i32
    %c0_i32_1 = arith.constant 0 : i32
    return %c0_i32, %c0_i32_0 : i32, i32
  }
  func.func @transform_2(%arg0: i32) -> (i32, i32) {
    %c0_i32 = arith.constant 0 : i32
    %c0_i32_0 = arith.constant 0 : i32
    %c0_i32_1 = arith.constant 0 : i32
    return %c0_i32, %c0_i32_0 : i32, i32
  }
  func.func @transform_3(%arg0: i32) -> (i32, i32) {
    %c0_i32 = arith.constant 0 : i32
    %c0_i32_0 = arith.constant 0 : i32
    %c0_i32_1 = arith.constant 0 : i32
    return %c0_i32, %c0_i32_0 : i32, i32
  }
  func.func @transform_4(%arg0: i32) -> (i32, i32) {
    %c0_i32 = arith.constant 0 : i32
    %c0_i32_0 = arith.constant 0 : i32
    %c0_i32_1 = arith.constant 0 : i32
    return %c0_i32, %c0_i32_0 : i32, i32
  }
  func.func @transform_5(%arg0: i32) -> (i32, i32) {
    %c0_i32 = arith.constant 0 : i32
    %c0_i32_0 = arith.constant 0 : i32
    %c0_i32_1 = arith.constant 0 : i32
    return %c0_i32, %c0_i32_0 : i32, i32
  }
  func.func @transform_6(%arg0: i32) -> (i32, i32) {
    %c0_i32 = arith.constant 0 : i32
    %c0_i32_0 = arith.constant 0 : i32
    %c0_i32_1 = arith.constant 0 : i32
    return %c0_i32, %c0_i32_0 : i32, i32
  }
  func.func @transform_7(%arg0: i32) -> (i32, i32) {
    %c0_i32 = arith.constant 0 : i32
    %c0_i32_0 = arith.constant 0 : i32
    %c0_i32_1 = arith.constant 0 : i32
    return %c0_i32, %c0_i32_0 : i32, i32
  }
  func.func @transform_8(%arg0: i32) -> (i32, i32) {
    %c0_i32 = arith.constant 0 : i32
    %c0_i32_0 = arith.constant 0 : i32
    %c0_i32_1 = arith.constant 0 : i32
    return %c0_i32, %c0_i32_0 : i32, i32
  }
  func.func @transform_9(%arg0: i32) -> (i32, i32) {
    %c0_i32 = arith.constant 0 : i32
    %c0_i32_0 = arith.constant 0 : i32
    %c0_i32_1 = arith.constant 0 : i32
    return %c0_i32, %c0_i32_0 : i32, i32
  }
  func.func @transform_10(%arg0: i32) -> (i32, i32) {
    %c0_i32 = arith.constant 0 : i32
    %c0_i32_0 = arith.constant 0 : i32
    %c0_i32_1 = arith.constant 0 : i32
    return %c0_i32, %c0_i32_0 : i32, i32
  }
  func.func @transform_11(%arg0: i32) -> (i32, i32) {
    %c0_i32 = arith.constant 0 : i32
    %c0_i32_0 = arith.constant 0 : i32
    return %arg0, %c0_i32 : i32, i32
  }
}

</mosaic_0001>

<bundles_post_ra>
// kernel: ae_mid_forward.1
= control target key start
LH: loop header
LB: loop body
LE: loop exit
PB: predicated region body
PF: predicated region fallthrough
CT: control target
= control target key end

     0   :  { %vm85_vm0 = vcmask 523264   ;;  %s1169_s0 = inlined_call_operand.vmem [shape: f32[32,64], index: 0, kind: input, shape index: {}]   ;;  %s1170_s1 = inlined_call_operand.vmem [shape: bf16[64,128], index: 1, kind: input, shape index: {}]   ;;  %s1171_s2 = inlined_call_operand.vmem [shape: f32[1,128], index: 2, kind: input, shape index: {}]   ;;  %s1172_s3 = inlined_call_operand.vmem [shape: bf16[128,128], index: 3, kind: input, shape index: {}]   ;;  %s1173_s4 = inlined_call_operand.vmem [shape: f32[1,128], index: 4, kind: input, shape index: {}]   ;;  %s1174_s5 = inlined_call_operand.vmem [shape: bf16[128,128], index: 5, kind: input, shape index: {}]   ;;  %s1175_s6 = inlined_call_operand.vmem [shape: f32[1,128], index: 6, kind: input, shape index: {}]   ;;  %s1176_s7 = inlined_call_operand.vmem [shape: bf16[128,128], index: 7, kind: input, shape index: {}]   ;;  %s1177_s8 = inlined_call_operand.vmem [shape: f32[1,128], index: 8, kind: input, shape index: {}]   ;;  %s1178_s9 = inlined_call_operand.vmem [shape: bf16[128,64], index: 9, kind: input, shape index: {}]   ;;  %s1179_s10 = inlined_call_operand.vmem [shape: f32[1,64], index: 10, kind: input, shape index: {}]   ;;  %s1180_s11 = inlined_call_operand.hbm [shape: f32[32,64], index: 11, kind: output, shape index: {}]  }
   0x1   :  { %v877_v0 = vld [vmem:[%s1170_s1] sm:$0xff]   ;;  %v878_v1 = vld [vmem:[%s1170_s1 + $0x8] sm:$0xff]   ;;  %v879_v2 = vld [vmem:[%s1170_s1 + $0x10] sm:$0xff]  }
   0x2   :  { %782 = vmatprep.subr.bf16.mxu0 %v877_v0  ;;  %v40_v3 = vld [vmem:[%s1169_s0] sm:$0xff]  ;;  %v41_v4 = vld [vmem:[%s1169_s0 + $0x8] sm:$0xff]  ;;  %v880_v8 = vld [vmem:[%s1170_s1 + $0x18] sm:$0xff]  }
   0x3   :  { %783 = vmatpush3.bf16.msra.mxu0 %v877_v0  ;;  %v44_v5 = vpack.c.bf16 %v41_v4, %v40_v3  ;;  %v881_v6 = vld [vmem:[%s1172_s3] sm:$0xff]   ;;  %v882_v7 = vld [vmem:[%s1172_s3 + $0x8] sm:$0xff]   ;;  %v42_v9 = vld [vmem:[%s1169_s0 + $0x10] sm:$0xff] }
   0x4   :  { %784 = vmatprep.subr.bf16.mxu0 %v878_v1  ;;  %794 = vmatprep.subr.bf16.mxu1 %v881_v6  ;;  %v883_v10 = vld [vmem:[%s1172_s3 + $0x10] sm:$0xff]   ;;  %v43_v11 = vld [vmem:[%s1169_s0 + $0x18] sm:$0xff]  ;;  %v885_v14 = vld [vmem:[%s1172_s3 + $0x20] sm:$0xff]  }
   0x5   :  { %790 = vmatprep.mubr.msk.bf16.mxu0 %vm85_vm0, %v44_v5  ;;  %795 = vmatpush3.bf16.msra.mxu1 %v881_v6  ;;  %v884_v12 = vld [vmem:[%s1172_s3 + $0x18] sm:$0xff]   ;;  %v45_v13 = vpack.c.bf16 %v43_v11, %v42_v9  ;;  %v886_v15 = vld [vmem:[%s1172_s3 + $0x28] sm:$0xff]  }
   0x6   :  { %796 = vmatprep.subr.bf16.mxu1 %v882_v7 }
   0x7   :  { %785 = vmatpush3.bf16.msra.mxu0 %v878_v1 }
   0x8   :  { %786 = vmatprep.subr.bf16.mxu0 %v879_v2 }
   0x9   :  { %797 = vmatpush3.bf16.msra.mxu1 %v882_v7 }
   0xa   :  { %798 = vmatprep.subr.bf16.mxu1 %v883_v10 }
   0xb   :  { %787 = vmatpush3.bf16.msra.mxu0 %v879_v2 }
   0xc   :  { %788 = vmatprep.subr.bf16.mxu0 %v880_v8 }
   0xd   :  { %799 = vmatpush3.bf16.msra.mxu1 %v883_v10 }
   0xe   :  { %800 = vmatprep.subr.bf16.mxu1 %v884_v12 }
   0xf   :  { %789 = vmatpush3.bf16.msra.mxu0 %v880_v8 }
  0x11   :  { %801 = vmatpush3.bf16.msra.mxu1 %v884_v12 }
  0x12   :  { %791 = vmatmul.mubr.msk.bf16.vlgmr.msra.gmra.mrb[0].mxu0 %vm85_vm0, %v45_v13  ;;  %802 = vmatprep.subr.bf16.mxu1 %v885_v14 }
  0x15   :  { %803 = vmatpush3.bf16.msra.mxu1 %v885_v14 }
  0x16   :  { %804 = vmatprep.subr.bf16.mxu1 %v886_v15 }
  0x17   :  { %16 = vsyncpa [#allocation3], 0  ;;  %v887_v16 = vld [vmem:[%s1172_s3 + $0x30] sm:$0xff]   ;;  %v888_v17 = vld [vmem:[%s1172_s3 + $0x38] sm:$0xff]  }
  0x18   :  { %v889_v18 = vld [vmem:[%s1174_s5] sm:$0xff]   ;;  %v890_v19 = vld [vmem:[%s1174_s5 + $0x8] sm:$0xff]   ;;  %v891_v20 = vld [vmem:[%s1174_s5 + $0x10] sm:$0xff]  }
  0x19   :  { %805 = vmatpush3.bf16.msra.mxu1 %v886_v15  ;;  %814 = vmatprep.subr.bf16.mxu0 %v889_v18  ;;  %v892_v21 = vld [vmem:[%s1174_s5 + $0x18] sm:$0xff]   ;;  %v893_v22 = vld [vmem:[%s1174_s5 + $0x20] sm:$0xff]   ;;  %v894_v23 = vld [vmem:[%s1174_s5 + $0x28] sm:$0xff]  }
  0x1a   :  { %806 = vmatprep.subr.bf16.mxu1 %v887_v16  ;;  %815 = vmatpush3.bf16.msra.mxu0 %v889_v18  ;;  %v689_v24 = vld [vmem:[%s1171_s2] ss:$0 sm:$0xff]  ;;  %v895_v39 = vld [vmem:[%s1174_s5 + $0x30] sm:$0xff]   ;;  %v896_v40 = vld [vmem:[%s1174_s5 + $0x38] sm:$0xff]  }
  0x1b   :  { %816 = vmatprep.subr.bf16.mxu0 %v890_v19  ;;  %v897_v41 = vld [vmem:[%s1176_s7] sm:$0xff]   ;;  %v898_v42 = vld [vmem:[%s1176_s7 + $0x8] sm:$0xff]   ;;  %v899_v43 = vld [vmem:[%s1176_s7 + $0x10] sm:$0xff]  }
  0x1c   :  { %v900_v44 = vld [vmem:[%s1176_s7 + $0x18] sm:$0xff]   ;;  %v901_v45 = vld [vmem:[%s1176_s7 + $0x20] sm:$0xff]   ;;  %v902_v46 = vld [vmem:[%s1176_s7 + $0x28] sm:$0xff]  }
  0x1d   :  { %807 = vmatpush3.bf16.msra.mxu1 %v887_v16  ;;  %v696_v47 = vld [vmem:[%s1173_s4] ss:$0 sm:$0xff]  ;;  %v903_v62 = vld [vmem:[%s1176_s7 + $0x30] sm:$0xff]   ;;  %v904_v63 = vld [vmem:[%s1176_s7 + $0x38] sm:$0xff]  }
  0x1e   :  { %808 = vmatprep.subr.bf16.mxu1 %v888_v17  ;;  %817 = vmatpush3.bf16.msra.mxu0 %v890_v19  ;;  %v905_v0 = vld [vmem:[%s1178_s9] sm:$0xff]   ;;  %v906_v1 = vld [vmem:[%s1178_s9 + $0x8] sm:$0xff]   ;;  %v907_v2 = vld [vmem:[%s1178_s9 + $0x10] sm:$0xff]  }
  0x1f   :  { %818 = vmatprep.subr.bf16.mxu0 %v891_v20  ;;  %v908_v3 = vld [vmem:[%s1178_s9 + $0x18] sm:$0xff]   ;;  %v909_v4 = vld [vmem:[%s1178_s9 + $0x20] sm:$0xff]   ;;  %v910_v5 = vld [vmem:[%s1178_s9 + $0x28] sm:$0xff]  }
  0x20   :  { %v705_v6 = vld [vmem:[%s1175_s6] ss:$0 sm:$0xff] }
  0x21   :  { %809 = vmatpush3.bf16.msra.mxu1 %v888_v17 }
  0x22   :  { %819 = vmatpush3.bf16.msra.mxu0 %v891_v20  ;;  %834 = vmatprep.subr.bf16.mxu1 %v897_v41 }
  0x23   :  { %820 = vmatprep.subr.bf16.mxu0 %v892_v21 }
  0x26   :  { %821 = vmatpush3.bf16.msra.mxu0 %v892_v21  ;;  %v911_v21 = vld [vmem:[%s1178_s9 + $0x30] sm:$0xff]  }
  0x27   :  { %822 = vmatprep.subr.bf16.mxu0 %v893_v22 }
  0x2a   :  { %823 = vmatpush3.bf16.msra.mxu0 %v893_v22  ;;  %v912_v22 = vld [vmem:[%s1178_s9 + $0x38] sm:$0xff]  }
  0x2b   :  { %824 = vmatprep.subr.bf16.mxu0 %v894_v23 }
  0x2e   :  { %825 = vmatpush3.bf16.msra.mxu0 %v894_v23  ;;  %v714_v23 = vld [vmem:[%s1177_s8] ss:$0 sm:$0xff]  ;;  %s953_s8 = smov [#allocation2]  }
  0x2f   :  { %826 = vmatprep.subr.bf16.mxu0 %v895_v39 }
  0x32   :  { %827 = vmatpush3.bf16.msra.mxu0 %v895_v39 }
  0x33   :  { %828 = vmatprep.subr.bf16.mxu0 %v896_v40 }
  0x36   :  { %829 = vmatpush3.bf16.msra.mxu0 %v896_v40 }
  0x37   :  { %854 = vmatprep.subr.bf16.mxu0 %v905_v0 }
  0xe5   :  { %v792_v25 = vpop.f32.mrb[0].mxu0 }
  0xe6   :  { %v135_v26 = vadd.f32 %v792_v25, %v689_v24  ;;  %v126_v27 = vpop.f32.mrb[1].mxu0 }
  0xe7   :  { %v127_v28 = vadd.f32 %v689_v24, %v126_v27  ;;  %v793_v29 = vpop.f32.mrb[2].mxu0 }
  0xe8   :  { %v138_v30 = vadd.f32 %v793_v29, %v689_v24  ;;  %v129_v31 = vpop.f32.mrb[3].mxu0  ;;  %v143_v33 = vmax.f32 %v135_v26, 0.0 }
  0xe9   :  { %v130_v32 = vadd.f32 %v689_v24, %v129_v31  ;;  %v141_v35 = vmax.f32 %v127_v28, 0.0 }
  0xea   :  { %v144_v34 = vmax.f32 %v138_v30, 0.0 }
  0xeb   :  { %v142_v36 = vmax.f32 %v130_v32, 0.0 }
  0xec   :  { %v146_v37 = vpack.c.bf16 %v144_v34, %v143_v33 }
  0xed   :  { %v145_v38 = vpack.c.bf16 %v142_v36, %v141_v35 }
  0xef   :  { %810 = vmatprep.mubr.bf16.mxu1 %v145_v38  ;;  %v723_v38 = vld [vmem:[%s1179_s10] ss:$0 sm:$0xff]  ;;  %s678_s10 = sshll.u32 %s953_s8, 4  ;;  %s679_s10 = int_to_ptr.vmem [resolvable:$true] %s678_s10 }
  0xf0   :  { %811 = vmatmul.mubr.bf16.vlgmr.msra.gmra.mrb[0].mxu1 %v146_v37  ;;  %s929_s3 = scalar_lea.vmem %s679_s10, 512  ;;  %p934_p1 = scmp.lt.s32.totalorder %s679_s10, %s679_s10 }
  0xf1   :  { %835 = vmatpush3.bf16.msra.mxu1 %v897_v41  ;;  %p930_p0 = scmp.ne.s32.totalorder %s679_s10, %s929_s3  ;;  %p935_p2 = scmp.lt.s32.totalorder %s929_s3, %s929_s3 }
  0xf2   :  { %836 = vmatprep.subr.bf16.mxu1 %v898_v42 }
  0xf3   :  { %p936_p3 = por %p935_p2, %p934_p1 }
  0xf5   :  { %837 = vmatpush3.bf16.msra.mxu1 %v898_v42  ;;  %p937_p4 = pnand %p936_p3, %p930_p0 }
  0xf6   :  { %838 = vmatprep.subr.bf16.mxu1 %v899_v43 }
  0xf9   :  { %839 = vmatpush3.bf16.msra.mxu1 %v899_v43 }
  0xfa   :  { %840 = vmatprep.subr.bf16.mxu1 %v900_v44 }
  0xfd   :  { %841 = vmatpush3.bf16.msra.mxu1 %v900_v44 }
  0xfe   :  { %842 = vmatprep.subr.bf16.mxu1 %v901_v45 }
 0x101   :  { %843 = vmatpush3.bf16.msra.mxu1 %v901_v45 }
 0x102   :  { %844 = vmatprep.subr.bf16.mxu1 %v902_v46 }
 0x105   :  { %845 = vmatpush3.bf16.msra.mxu1 %v902_v46 }
 0x106   :  { %846 = vmatprep.subr.bf16.mxu1 %v903_v62 }
 0x109   :  { %847 = vmatpush3.bf16.msra.mxu1 %v903_v62 }
 0x10a   :  { %848 = vmatprep.subr.bf16.mxu1 %v904_v63 }
 0x10d   :  { %849 = vmatpush3.bf16.msra.mxu1 %v904_v63 }
 0x1c3   :  { %v812_v48 = vpop.f32.mrb[0].mxu1 }
 0x1c4   :  { %v261_v49 = vadd.f32 %v812_v48, %v696_v47  ;;  %v252_v50 = vpop.f32.mrb[1].mxu1 }
 0x1c5   :  { %v253_v51 = vadd.f32 %v696_v47, %v252_v50  ;;  %v813_v52 = vpop.f32.mrb[2].mxu1 }
 0x1c6   :  { %v264_v53 = vadd.f32 %v813_v52, %v696_v47  ;;  %v255_v54 = vpop.f32.mrb[3].mxu1  ;;  %v269_v56 = vmax.f32 %v261_v49, 0.0 }
 0x1c7   :  { %v256_v55 = vadd.f32 %v696_v47, %v255_v54  ;;  %v267_v58 = vmax.f32 %v253_v51, 0.0 }
 0x1c8   :  { %v270_v57 = vmax.f32 %v264_v53, 0.0 }
 0x1c9   :  { %v268_v59 = vmax.f32 %v256_v55, 0.0 }
 0x1ca   :  { %v272_v60 = vpack.c.bf16 %v270_v57, %v269_v56 }
 0x1cb   :  { %v271_v61 = vpack.c.bf16 %v268_v59, %v267_v58 }
 0x1cd   :  { %830 = vmatprep.mubr.bf16.mxu0 %v271_v61 }
 0x1ce   :  { %831 = vmatmul.mubr.bf16.vlgmr.msra.gmra.mrb[4].mxu0 %v272_v60 }
 0x1cf   :  { %855 = vmatpush3.bf16.msra.mxu0 %v905_v0 }
 0x1d0   :  { %856 = vmatprep.subr.bf16.mxu0 %v906_v1 }
 0x1d3   :  { %857 = vmatpush3.bf16.msra.mxu0 %v906_v1 }
 0x1d4   :  { %858 = vmatprep.subr.bf16.mxu0 %v907_v2 }
 0x1d7   :  { %859 = vmatpush3.bf16.msra.mxu0 %v907_v2 }
 0x1d8   :  { %860 = vmatprep.subr.bf16.mxu0 %v908_v3 }
 0x1db   :  { %861 = vmatpush3.bf16.msra.mxu0 %v908_v3 }
 0x1dc   :  { %862 = vmatprep.subr.bf16.mxu0 %v909_v4 }
 0x1df   :  { %863 = vmatpush3.bf16.msra.mxu0 %v909_v4 }
 0x1e0   :  { %864 = vmatprep.subr.bf16.mxu0 %v910_v5 }
 0x1e3   :  { %865 = vmatpush3.bf16.msra.mxu0 %v910_v5 }
 0x1e4   :  { %866 = vmatprep.subr.bf16.mxu0 %v911_v21 }
 0x1e7   :  { %867 = vmatpush3.bf16.msra.mxu0 %v911_v21 }
 0x1e8   :  { %868 = vmatprep.subr.bf16.mxu0 %v912_v22 }
 0x1eb   :  { %869 = vmatpush3.bf16.msra.mxu0 %v912_v22 }
 0x2a1   :  { %v832_v7 = vpop.f32.mrb[4].mxu0 }
 0x2a2   :  { %v387_v8 = vadd.f32 %v832_v7, %v705_v6  ;;  %v378_v9 = vpop.f32.mrb[5].mxu0 }
 0x2a3   :  { %v379_v10 = vadd.f32 %v705_v6, %v378_v9  ;;  %v833_v11 = vpop.f32.mrb[6].mxu0 }
 0x2a4   :  { %v390_v12 = vadd.f32 %v833_v11, %v705_v6  ;;  %v381_v13 = vpop.f32.mrb[7].mxu0  ;;  %v395_v15 = vmax.f32 %v387_v8, 0.0 }
 0x2a5   :  { %v382_v14 = vadd.f32 %v705_v6, %v381_v13  ;;  %v393_v17 = vmax.f32 %v379_v10, 0.0 }
 0x2a6   :  { %v396_v16 = vmax.f32 %v390_v12, 0.0 }
 0x2a7   :  { %v394_v18 = vmax.f32 %v382_v14, 0.0 }
 0x2a8   :  { %v398_v19 = vpack.c.bf16 %v396_v16, %v395_v15 }
 0x2a9   :  { %v397_v20 = vpack.c.bf16 %v394_v18, %v393_v17 }
 0x2ab   :  { %850 = vmatprep.mubr.bf16.mxu1 %v397_v20 }
 0x2ac   :  { %851 = vmatmul.mubr.bf16.vlgmr.msra.gmra.mrb[4].mxu1 %v398_v19 }
 0x37f   :  { %v852_v24 = vpop.f32.mrb[4].mxu1 }
 0x380   :  { %v513_v25 = vadd.f32 %v852_v24, %v714_v23  ;;  %v504_v26 = vpop.f32.mrb[5].mxu1 }
 0x381   :  { %v505_v27 = vadd.f32 %v714_v23, %v504_v26  ;;  %v853_v28 = vpop.f32.mrb[6].mxu1 }
 0x382   :  { %v516_v29 = vadd.f32 %v853_v28, %v714_v23  ;;  %v507_v30 = vpop.f32.mrb[7].mxu1  ;;  %v521_v32 = vmax.f32 %v513_v25, 0.0 }
 0x383   :  { %v508_v31 = vadd.f32 %v714_v23, %v507_v30  ;;  %v519_v34 = vmax.f32 %v505_v27, 0.0 }
 0x384   :  { %v522_v33 = vmax.f32 %v516_v29, 0.0 }
 0x385   :  { %v520_v35 = vmax.f32 %v508_v31, 0.0 }
 0x386   :  { %v524_v36 = vpack.c.bf16 %v522_v33, %v521_v32 }
 0x387   :  { %v523_v37 = vpack.c.bf16 %v520_v35, %v519_v34 }
 0x389   :  { %870 = vmatprep.mubr.bf16.mxu0 %v523_v37 }
 0x38a   :  { %871 = vmatmul.mubr.bf16.vlgmr.msra.gmra.mrb[8].mxu0 %v524_v36 }
 0x45d   :  { %v872_v39 = vpop.f32.mrb[8].mxu0 }
 0x45e   :  { %v639_v40 = vadd.f32 %v872_v39, %v723_v38  ;;  %v630_v41 = vpop.f32.mrb[9].mxu0 }
 0x45f   :  { %v631_v42 = vadd.f32 %v723_v38, %v630_v41  ;;  %v873_v43 = vpop.f32.mrb[10].mxu0 }
 0x460   :  { %v734_v44 = vmul.f32 -1.442695, %v639_v40  ;;  %v642_v45 = vadd.f32 %v873_v43, %v723_v38  ;;  %v633_v46 = vpop.f32.mrb[11].mxu0 }
 0x461   :  { %v732_v47 = vmul.f32 -1.442695, %v631_v42  ;;  %v634_v48 = vadd.f32 %v723_v38, %v633_v46 }
 0x462   :  { %913 = vpow2.f32 %v734_v44  ;;  %v735_v49 = vmul.f32 -1.442695, %v642_v45 }
 0x463   :  { %915 = vpow2.f32 %v732_v47  ;;  %v733_v50 = vmul.f32 -1.442695, %v634_v48 }
 0x464   :  { %917 = vpow2.f32 %v735_v49 }
 0x465   :  { %919 = vpow2.f32 %v733_v50 }
 0x46c   :  { %v914_v51 = vpop.eup %913 }
 0x46d   :  { %v916_v52 = vpop.eup %915  ;;  %v659_v53 = vadd.f32 1.0, %v914_v51 }
 0x46e   :  { %v918_v54 = vpop.eup %917  ;;  %v657_v55 = vadd.f32 1.0, %v916_v52 }
 0x46f   :  { %v920_v56 = vpop.eup %919  ;;  %921 = vrcp.f32 %v659_v53  ;;  %v660_v57 = vadd.f32 1.0, %v918_v54 }
 0x470   :  { %923 = vrcp.f32 %v657_v55  ;;  %v658_v58 = vadd.f32 1.0, %v920_v56 }
 0x471   :  { %925 = vrcp.f32 %v660_v57 }
 0x472   :  { %927 = vrcp.f32 %v658_v58 }
 0x479   :  { %v922_v59 = vpop.eup %921 }
 0x47a   :  { %v924_v60 = vpop.eup %923  ;;  %671 = vst.msk [vmem:[#allocation2 + $0x10] sm:$0xff] %vm85_vm0, %v922_v59 }
 0x47b   :  { %v926_v61 = vpop.eup %925  ;;  %669 = vst.msk [vmem:[#allocation2] sm:$0xff] %vm85_vm0, %v924_v60 }
 0x47c   :  { %v928_v62 = vpop.eup %927  ;;  %672 = vst.msk [vmem:[#allocation2 + $0x18] sm:$0xff] %vm85_vm0, %v926_v61 }
 0x47d   :  { %670 = vst.msk [vmem:[#allocation2 + $0x8] sm:$0xff] %vm85_vm0, %v928_v62 }
 0x47e   :  { %940 = shalt.err (!%p937_p4)
}
 0x47f   :  { %s941_s17 = scalar_lea.hbm %s1180_s11, 512 }
 0x480   :  { %p942_p5 = scmp.ne.s32.totalorder %s1180_s11, %s941_s17  ;;  %p945_p6 = scmp.lt.u32.totalorder %s941_s17, %s1180_s11 }
 0x482   :  { %p947_p7 = pnand %p945_p6, %p942_p5 }
 0x484   :  { %950 = shalt.err (!%p947_p7)
}
 0x485   :  { %s954_s21 = smov 128   ;;  %s955_s1 = smov 8  }
 0x486   :  { %684 = dma.vmem_to_hbm [thread:$0]  %s679_s10, 512, %s1180_s11, [#allocation3], %s954_s21, %s954_s21, %s955_s1  }
 0x487   :  { %951 = dma.done.wait [#allocation3], 512  }
 0x488   :  { %952 = vsyncadd [#allocation3], 4294966784 }
 0x489   :  { %688 = vsyncpa [#allocation3], 1 }

</bundles_post_ra>
